<compile_context>
chip_gen: v7x
topology: tpu7x:2x2x1
jax: 0.10.0
libtpu: 0.0.40
codegen_flags: <defaults>
</compile_context>

<pallas_src>
import jax
import jax.numpy as jnp
from jax.experimental import pallas as pl
from jax.experimental.pallas import tpu as pltpu

# ----------------------- small synthetic config -----------------------------
B = 2            # batch
C_IN = 4         # input channels
H = W = 16       # spatial
C_OUT = 32       # feature dim D (single backbone layer, GAP'd)
KH = KW = 3      # conv kernel size
N_PCA = 16       # n_pca_components
N_TRAIN = 64     # KDE "training" points (synthetic stand-in for max_training_points)

K_IM2COL = KH * KW * C_IN       # 36
K_AUG = K_IM2COL + 1            # +1 ones column carrying the conv bias
N_PIX = B * H * W               # 512


def _vmem_full(shape):
    """Whole-array block resident in VMEM (grid=(1,))."""
    nd = len(shape)
    return pl.BlockSpec(shape, lambda i, _nd=nd: (0,) * _nd)


# --------------------------- fused kernel ------------------------------------
def dfkde_fused_kernel(patches_ref, w_ref, pool_ref, proj_ref, pbias_ref,
                       train_ref, ntsq_ref, norm_ref, o_ref):
    """Backbone conv (im2col) + GAP + folded KDE classifier, in one kernel.

    patches_ref: (B*H*W, K_AUG)   bf16  im2col patches, last column = 1 (bias)
    w_ref:       (K_AUG, C_OUT)   bf16  flattened conv weights, last row = bias
    pool_ref:    (B, B*H*W)       bf16  block-diag 1/(H*W) global-avg-pool matrix
    proj_ref:    (C_OUT, N_PCA)   bf16  folded (PCA / max_len) @ bw_transform
    pbias_ref:   (1, N_PCA)       f32   folded -(mean @ sv / max_len) @ bw
    train_ref:   (N_TRAIN, N_PCA) bf16  fitted, bw-transformed KDE dataset
    ntsq_ref:    (1, N_TRAIN)     f32   precomputed -0.5 * ||train_j||^2
    norm_ref:    (1,)             f32   SMEM scalar: kde_norm / N_TRAIN
    o_ref:       (B, 1)           f32   anomaly probabilities
    """
    # ---- synthetic backbone: 3x3 SAME conv (bias folded) + ReLU, one matmul ----
    conv = jnp.maximum(
        jnp.dot(patches_ref[...], w_ref[...],
                preferred_element_type=jnp.float32),
        0.0)                                                     # (B*H*W, C_OUT)

    # ---- global average pool as a matmul (no reshape / cross-sublane reduce) ----
    feat = jnp.dot(pool_ref[...], conv.astype(jnp.bfloat16),
                   preferred_element_type=jnp.float32)           # (B, C_OUT)

    # ---- KDEClassifier: folded PCA + SCALE + bandwidth projection ----
    y = jnp.dot(feat.astype(proj_ref.dtype), proj_ref[...],
                preferred_element_type=jnp.float32) + pbias_ref[...]   # (B, P)

    # exp(-0.5*||y - t||^2) = exp(y.t - 0.5*||y||^2 - 0.5*||t||^2); arg <= 0
    neg_half_ysq = -0.5 * jnp.sum(y * y, axis=1, keepdims=True)         # (B, 1)
    cross = jax.lax.dot_general(y.astype(train_ref.dtype), train_ref[...],
                                (((1,), (1,)), ((), ())),
                                preferred_element_type=jnp.float32)     # (B, N)
    exparg = jnp.minimum(cross + neg_half_ysq + ntsq_ref[...], 0.0)     # (B, N)

    # mean_j exp(arg) * norm  ==  sum_j exp(arg) * (norm / N)
    kde = jnp.sum(jnp.exp(exparg), axis=1, keepdims=True) * norm_ref[0]
    # eps = 1e-30 (1e-300 underflows to 0 in f32 -> -inf score on KDE underflow)
    score = jnp.log(kde + jnp.float32(1e-30))
    prob = 1.0 / (1.0 + jnp.exp(0.05 * (score - 12.0)))
    o_ref[...] = prob.astype(o_ref.dtype)


# ------------------------------ glue / wrapper --------------------------------
def _im2col_aug(image_nchw):
    """NCHW image -> (B*H*W, K_AUG) im2col patch matrix with a trailing ones col."""
    x = jnp.transpose(image_nchw, (0, 2, 3, 1)).astype(jnp.float32)   # NHWC
    xp = jnp.pad(x, ((0, 0), (1, 1), (1, 1), (0, 0)))                  # SAME pad
    parts = [xp[:, kh:kh + H, kw:kw + W, :]
             for kh in range(KH) for kw in range(KW)]
    patches = jnp.concatenate(parts, axis=-1).reshape(N_PIX, K_IM2COL)
    ones = jnp.ones((N_PIX, 1), jnp.float32)                           # bias column
    return jnp.concatenate([patches, ones], axis=-1)                   # (N_PIX, K_AUG)


def fold_kernel_params(raw):
    """Fold fitted (PCA, scaling, bandwidth, KDE) state into kernel-ready params."""
    sv_bw = raw["pca_sv"] @ raw["bw_transform"]                    # (D, P)
    inv_len = 1.0 / raw["max_length"][0, 0]
    proj = sv_bw * inv_len                                         # (D, P)
    pbias = -(raw["pca_mean"] @ sv_bw) * inv_len                   # (1, P)

    w_flat = raw["conv_w"].reshape(K_IM2COL, C_OUT)
    w_aug = jnp.concatenate([w_flat, raw["conv_b"]], axis=0)       # (K_AUG, D)

    # block-diagonal global-average-pool matrix: row b averages pixels of image b
    pool = jnp.kron(jnp.eye(B, dtype=jnp.float32),
                    jnp.ones((1, H * W), jnp.float32)) / float(H * W)   # (B, N_PIX)

    train_bf16 = raw["kde_dataset"].astype(jnp.bfloat16)
    neg_half_tsq = -0.5 * jnp.sum(train_bf16.astype(jnp.float32) ** 2,
                                  axis=1)[None, :]                 # (1, N)
    return {
        "patch_w": w_aug.astype(jnp.bfloat16),
        "pool": pool.astype(jnp.bfloat16),
        "proj": proj.astype(jnp.bfloat16),
        "proj_bias": pbias.astype(jnp.float32),
        "train": train_bf16,
        "neg_half_tsq": neg_half_tsq.astype(jnp.float32),
        "norm_scaled": (raw["kde_norm"].reshape(()) / N_TRAIN)
                       .reshape(1).astype(jnp.float32),
    }


@jax.jit
def dfkde_forward(image_nchw, kp):
    """Eval-mode DfkdeModel.forward: image (B, C, H, W) -> probabilities (B,)."""
    patches = _im2col_aug(image_nchw).astype(jnp.bfloat16)

    probs = pl.pallas_call(
        dfkde_fused_kernel,
        out_shape=jax.ShapeDtypeStruct((B, 1), jnp.float32),
        grid=(1,),
        in_specs=[_vmem_full(patches.shape),
                  _vmem_full(kp["patch_w"].shape),
                  _vmem_full(kp["pool"].shape),
                  _vmem_full(kp["proj"].shape),
                  _vmem_full(kp["proj_bias"].shape),
                  _vmem_full(kp["train"].shape),
                  _vmem_full(kp["neg_half_tsq"].shape),
                  pl.BlockSpec(memory_space=pltpu.MemorySpace.SMEM)],
        out_specs=_vmem_full((B, 1)),
        compiler_params=pltpu.CompilerParams(
            dimension_semantics=("arbitrary",)),
    )(patches, kp["patch_w"], kp["pool"], kp["proj"], kp["proj_bias"],
      kp["train"], kp["neg_half_tsq"], kp["norm_scaled"])

    return probs[:, 0]


def init_params(key):
    """Deterministic synthetic parameters (shapes implied by the module init)."""
    ks = jax.random.split(key, 6)
    return {
        # synthetic feature-extractor conv (stand-in for the timm backbone layer)
        "conv_w": 0.1 * jax.random.normal(ks[0], (KH, KW, C_IN, C_OUT), jnp.float32),
        "conv_b": 0.01 * jax.random.normal(ks[1], (1, C_OUT), jnp.float32),
        # KDEClassifier buffers (PCA + GaussianKDE fitted state, synthetic)
        "pca_mean": 0.1 * jax.random.normal(ks[2], (1, C_OUT), jnp.float32),
        "pca_sv": 0.2 * jax.random.normal(ks[3], (C_OUT, N_PCA), jnp.float32),
        "max_length": jnp.array([[1.5]], jnp.float32),
        "bw_transform": jnp.eye(N_PCA, dtype=jnp.float32)
                        + 0.05 * jax.random.normal(ks[4], (N_PCA, N_PCA), jnp.float32),
        "kde_dataset": 0.5 * jax.random.normal(ks[5], (N_TRAIN, N_PCA), jnp.float32),
        "kde_norm": jnp.array([[0.05]], jnp.float32),
    }


if __name__ == "__main__":
    key = jax.random.PRNGKey(0)
    k_img, k_par = jax.random.split(key)
    image = jax.random.normal(k_img, (B, C_IN, H, W), jnp.float32)  # NCHW like torch
    raw_params = init_params(k_par)
    kernel_params = fold_kernel_params(raw_params)

    out = dfkde_forward(image, kernel_params)
    out = jax.block_until_ready(out)

    assert out.shape == (B,), out.shape
    assert bool(jnp.all(jnp.isfinite(out)))
    assert bool(jnp.all((out >= 0.0) & (out <= 1.0)))
    # TODO(synk): pretrained timm backbone replaced by a synthetic conv+GAP extractor.
    print("KERNEL_OK")
</pallas_src>

<mosaic_0001>
module attributes {stable_mosaic.version = 11 : i64} {
  func.func @dfkde_fused_kernel(%arg0: i32, %arg1: memref<512x37xbf16, #tpu.memory_space<vmem>>, %arg2: memref<37x32xbf16, #tpu.memory_space<vmem>>, %arg3: memref<2x512xbf16, #tpu.memory_space<vmem>>, %arg4: memref<32x16xbf16, #tpu.memory_space<vmem>>, %arg5: memref<1x16xf32, #tpu.memory_space<vmem>>, %arg6: memref<64x16xbf16, #tpu.memory_space<vmem>>, %arg7: memref<1x64xf32, #tpu.memory_space<vmem>>, %arg8: memref<1xf32, #tpu.memory_space<smem>>, %arg9: memref<2x1xf32, #tpu.memory_space<vmem>>) attributes {dimension_semantics = [#tpu.dimension_semantics<arbitrary>], iteration_bounds = array<i64: 1>, scalar_prefetch = 0 : i64, scratch_operands = 0 : i64, tpu.core_type = #tpu.core_type<tc>, window_params = [{pipeline_mode = #tpu.pipeline_mode<synchronous>, transform_indices = @transform_0, window_bounds = array<i64: 512, 37>}, {pipeline_mode = #tpu.pipeline_mode<synchronous>, transform_indices = @transform_1, window_bounds = array<i64: 37, 32>}, {pipeline_mode = #tpu.pipeline_mode<synchronous>, transform_indices = @transform_2, window_bounds = array<i64: 2, 512>}, {pipeline_mode = #tpu.pipeline_mode<synchronous>, transform_indices = @transform_3, window_bounds = array<i64: 32, 16>}, {pipeline_mode = #tpu.pipeline_mode<synchronous>, transform_indices = @transform_4, window_bounds = array<i64: 1, 16>}, {pipeline_mode = #tpu.pipeline_mode<synchronous>, transform_indices = @transform_5, window_bounds = array<i64: 64, 16>}, {pipeline_mode = #tpu.pipeline_mode<synchronous>, transform_indices = @transform_6, window_bounds = array<i64: 1, 64>}, {transform_indices = @transform_7, window_bounds = array<i64: 1>}, {pipeline_mode = #tpu.pipeline_mode<synchronous>, transform_indices = @transform_8, window_bounds = array<i64: 2, 1>}]} {
    %c0 = arith.constant 0 : index
    %c0_0 = arith.constant 0 : index
    %0 = vector.load %arg1[%c0, %c0_0] : memref<512x37xbf16, #tpu.memory_space<vmem>>, vector<512x37xbf16>
    %c0_1 = arith.constant 0 : index
    %c0_2 = arith.constant 0 : index
    %1 = vector.load %arg2[%c0_1, %c0_2] : memref<37x32xbf16, #tpu.memory_space<vmem>>, vector<37x32xbf16>
    %cst = arith.constant dense<0.000000e+00> : vector<512x32xf32>
    %2 = tpu.matmul %0, %1, %cst {dimension_numbers = #tpu.dot_dimension_numbers<[1], [0], [0], [1], [0, 0, 1, 1], [], []>} : vector<512x37xbf16>, vector<37x32xbf16>, vector<512x32xf32> -> vector<512x32xf32>
    %cst_3 = arith.constant 0.000000e+00 : f32
    %3 = vector.broadcast %cst_3 : f32 to vector<512x32xf32>
    %4 = arith.maximumf %2, %3 : vector<512x32xf32>
    %c0_4 = arith.constant 0 : index
    %c0_5 = arith.constant 0 : index
    %5 = vector.load %arg3[%c0_4, %c0_5] : memref<2x512xbf16, #tpu.memory_space<vmem>>, vector<2x512xbf16>
    %6 = arith.truncf %4 : vector<512x32xf32> to vector<512x32xbf16>
    %cst_6 = arith.constant dense<0.000000e+00> : vector<2x32xf32>
    %7 = tpu.matmul %5, %6, %cst_6 {dimension_numbers = #tpu.dot_dimension_numbers<[1], [0], [0], [1], [0, 0, 1, 1], [], []>} : vector<2x512xbf16>, vector<512x32xbf16>, vector<2x32xf32> -> vector<2x32xf32>
    %8 = arith.truncf %7 : vector<2x32xf32> to vector<2x32xbf16>
    %c0_7 = arith.constant 0 : index
    %c0_8 = arith.constant 0 : index
    %9 = vector.load %arg4[%c0_7, %c0_8] : memref<32x16xbf16, #tpu.memory_space<vmem>>, vector<32x16xbf16>
    %cst_9 = arith.constant dense<0.000000e+00> : vector<2x16xf32>
    %10 = tpu.matmul %8, %9, %cst_9 {dimension_numbers = #tpu.dot_dimension_numbers<[1], [0], [0], [1], [0, 0, 1, 1], [], []>} : vector<2x32xbf16>, vector<32x16xbf16>, vector<2x16xf32> -> vector<2x16xf32>
    %c0_10 = arith.constant 0 : index
    %c0_11 = arith.constant 0 : index
    %11 = vector.load %arg5[%c0_10, %c0_11] : memref<1x16xf32, #tpu.memory_space<vmem>>, vector<1x16xf32>
    %12 = vector.broadcast %11 : vector<1x16xf32> to vector<2x16xf32>
    %13 = arith.addf %10, %12 : vector<2x16xf32>
    %14 = arith.mulf %13, %13 : vector<2x16xf32>
    %cst_12 = arith.constant dense<0.000000e+00> : vector<2xf32>
    %15 = vector.multi_reduction <add>, %14, %cst_12 [1] : vector<2x16xf32> to vector<2xf32>
    %16 = vector.shape_cast %15 : vector<2xf32> to vector<2x1xf32>
    %cst_13 = arith.constant -5.000000e-01 : f32
    %17 = vector.broadcast %cst_13 : f32 to vector<2x1xf32>
    %18 = arith.mulf %17, %16 : vector<2x1xf32>
    %19 = arith.truncf %13 : vector<2x16xf32> to vector<2x16xbf16>
    %c0_14 = arith.constant 0 : index
    %c0_15 = arith.constant 0 : index
    %20 = vector.load %arg6[%c0_14, %c0_15] : memref<64x16xbf16, #tpu.memory_space<vmem>>, vector<64x16xbf16>
    %cst_16 = arith.constant dense<0.000000e+00> : vector<2x64xf32>
    %21 = tpu.matmul %19, %20, %cst_16 {dimension_numbers = #tpu.dot_dimension_numbers<[1], [1], [0], [0], [0, 0, 1, 0], [], []>} : vector<2x16xbf16>, vector<64x16xbf16>, vector<2x64xf32> -> vector<2x64xf32>
    %22 = vector.broadcast %18 : vector<2x1xf32> to vector<2x64xf32>
    %23 = arith.addf %21, %22 : vector<2x64xf32>
    %c0_17 = arith.constant 0 : index
    %c0_18 = arith.constant 0 : index
    %24 = vector.load %arg7[%c0_17, %c0_18] : memref<1x64xf32, #tpu.memory_space<vmem>>, vector<1x64xf32>
    %25 = vector.broadcast %24 : vector<1x64xf32> to vector<2x64xf32>
    %26 = arith.addf %23, %25 : vector<2x64xf32>
    %cst_19 = arith.constant 0.000000e+00 : f32
    %27 = vector.broadcast %cst_19 : f32 to vector<2x64xf32>
    %28 = arith.minimumf %26, %27 : vector<2x64xf32>
    %29 = math.exp %28 : vector<2x64xf32>
    %cst_20 = arith.constant dense<0.000000e+00> : vector<2xf32>
    %30 = vector.multi_reduction <add>, %29, %cst_20 [1] : vector<2x64xf32> to vector<2xf32>
    %31 = vector.shape_cast %30 : vector<2xf32> to vector<2x1xf32>
    %c0_21 = arith.constant 0 : index
    %32 = memref.load %arg8[%c0_21] : memref<1xf32, #tpu.memory_space<smem>>
    %33 = vector.broadcast %32 : f32 to vector<2x1xf32>
    %34 = arith.mulf %31, %33 : vector<2x1xf32>
    %cst_22 = arith.constant 1.000000e-30 : f32
    %35 = vector.broadcast %cst_22 : f32 to vector<2x1xf32>
    %36 = arith.addf %34, %35 : vector<2x1xf32>
    %37 = math.log %36 : vector<2x1xf32>
    %cst_23 = arith.constant 1.200000e+01 : f32
    %38 = vector.broadcast %cst_23 : f32 to vector<2x1xf32>
    %39 = arith.subf %37, %38 : vector<2x1xf32>
    %cst_24 = arith.constant 5.000000e-02 : f32
    %40 = vector.broadcast %cst_24 : f32 to vector<2x1xf32>
    %41 = arith.mulf %40, %39 : vector<2x1xf32>
    %42 = math.exp %41 : vector<2x1xf32>
    %cst_25 = arith.constant 1.000000e+00 : f32
    %43 = vector.broadcast %cst_25 : f32 to vector<2x1xf32>
    %44 = arith.addf %43, %42 : vector<2x1xf32>
    %cst_26 = arith.constant 1.000000e+00 : f32
    %45 = vector.broadcast %cst_26 : f32 to vector<2x1xf32>
    %46 = arith.divf %45, %44 : vector<2x1xf32>
    %c0_27 = arith.constant 0 : index
    %c0_28 = arith.constant 0 : index
    %47 = vector.load %arg9[%c0_27, %c0_28] : memref<2x1xf32, #tpu.memory_space<vmem>>, vector<2x1xf32>
    tpu.vector_store %arg9[%c0_27, %c0_28], %46 {strides = array<i32>} : memref<2x1xf32, #tpu.memory_space<vmem>>, vector<2x1xf32>,
    return
  }
  func.func @transform_0(%arg0: i32) -> (i32, i32) {
    %c0_i32 = arith.constant 0 : i32
    %c0_i32_0 = arith.constant 0 : i32
    %c0_i32_1 = arith.constant 0 : i32
    return %c0_i32, %c0_i32_0 : i32, i32
  }
  func.func @transform_1(%arg0: i32) -> (i32, i32) {
    %c0_i32 = arith.constant 0 : i32
    %c0_i32_0 = arith.constant 0 : i32
    %c0_i32_1 = arith.constant 0 : i32
    return %c0_i32, %c0_i32_0 : i32, i32
  }
  func.func @transform_2(%arg0: i32) -> (i32, i32) {
    %c0_i32 = arith.constant 0 : i32
    %c0_i32_0 = arith.constant 0 : i32
    %c0_i32_1 = arith.constant 0 : i32
    return %c0_i32, %c0_i32_0 : i32, i32
  }
  func.func @transform_3(%arg0: i32) -> (i32, i32) {
    %c0_i32 = arith.constant 0 : i32
    %c0_i32_0 = arith.constant 0 : i32
    %c0_i32_1 = arith.constant 0 : i32
    return %c0_i32, %c0_i32_0 : i32, i32
  }
  func.func @transform_4(%arg0: i32) -> (i32, i32) {
    %c0_i32 = arith.constant 0 : i32
    %c0_i32_0 = arith.constant 0 : i32
    %c0_i32_1 = arith.constant 0 : i32
    return %c0_i32, %c0_i32_0 : i32, i32
  }
  func.func @transform_5(%arg0: i32) -> (i32, i32) {
    %c0_i32 = arith.constant 0 : i32
    %c0_i32_0 = arith.constant 0 : i32
    %c0_i32_1 = arith.constant 0 : i32
    return %c0_i32, %c0_i32_0 : i32, i32
  }
  func.func @transform_6(%arg0: i32) -> (i32, i32) {
    %c0_i32 = arith.constant 0 : i32
    %c0_i32_0 = arith.constant 0 : i32
    %c0_i32_1 = arith.constant 0 : i32
    return %c0_i32, %c0_i32_0 : i32, i32
  }
  func.func @transform_7(%arg0: i32) -> i32 {
    %c0_i32 = arith.constant 0 : i32
    %c0_i32_0 = arith.constant 0 : i32
    return %c0_i32 : i32
  }
  func.func @transform_8(%arg0: i32) -> (i32, i32) {
    %c0_i32 = arith.constant 0 : i32
    %c0_i32_0 = arith.constant 0 : i32
    %c0_i32_1 = arith.constant 0 : i32
    return %c0_i32, %c0_i32_0 : i32, i32
  }
}

</mosaic_0001>

<bundles_post_ra>
// kernel: dfkde_forward.1
= control target key start
LH: loop header
LB: loop body
LE: loop exit
PB: predicated region body
PF: predicated region fallthrough
CT: control target
= control target key end

     0   :  { %vm372_vm0 = vcmask 1041408   ;;  %vm373_vm1 = vcmask 1042432   ;;  %vm275_vm2 = vcmask 302080   ;;  %v1376_v1 = vmov 65535   ;;  %s1615_s1 = inlined_call_operand.vmem [shape: bf16[37,32], index: 1, kind: input, shape index: {}]   ;;  %s1616_s0 = inlined_call_operand.vmem [shape: bf16[512,37], index: 0, kind: input, shape index: {}]   ;;  %s1617_s2 = inlined_call_operand.vmem [shape: bf16[2,512], index: 2, kind: input, shape index: {}]   ;;  %s1618_s3 = inlined_call_operand.vmem [shape: bf16[32,16], index: 3, kind: input, shape index: {}]   ;;  %s1619_s5 = inlined_call_operand.vmem [shape: bf16[64,16], index: 5, kind: input, shape index: {}]   ;;  %s1620_s4 = inlined_call_operand.vmem [shape: f32[1,16], index: 4, kind: input, shape index: {}]   ;;  %s1621_s6 = inlined_call_operand.vmem [shape: f32[1,64], index: 6, kind: input, shape index: {}]   ;;  %s1622_s7 = inlined_call_operand.<no memory space> [shape: f32[1], index: 7, kind: input, shape index: {}]   ;;  %s1623_s8 = inlined_call_operand.vmem [shape: f32[2,1], index: 8, kind: output, shape index: {}]  }
   0x1   :  { %v1327_v0 = vld [vmem:[%s1615_s1] sm:$0xff]   ;;  %v374_v2 = vsel %vm372_vm0, 4294967295, %v1376_v1  ;;  %v1328_v3 = vld [vmem:[%s1615_s1 + $0x8] sm:$0xff]   ;;  %v1329_v5 = vld [vmem:[%s1615_s1 + $0x10] ss:$0 sps:$4 sm:$0x77]   ;;  %v777_v41 = vlaneseq }
   0x2   :  { %v375_v4 = vsel %vm373_vm1, %v374_v2, 0  ;;  %1233 = vmatprep.subr.bf16.mxu0 %v1327_v0  ;;  %v1330_v6 = vld [vmem:[%s1616_s0] sm:$0xff]   ;;  %v1331_v8 = vld [vmem:[%s1616_s0 + $0x8] sm:$0xff]   ;;  %v1332_v9 = vld [vmem:[%s1616_s0 + $0x10] sm:$0xff]   ;;  %v1377_v39 = vmov 1966171168  }
   0x3   :  { %1234 = vmatpush3.bf16.msra.mxu0 %v1327_v0  ;;  %v377_v7 = vand.u32 %v1329_v5, %v375_v4  ;;  %1239 = vmatprep.mubr.msk.bf16.mxu0 %vm275_vm2, %v1330_v6  ;;  %v1333_v10 = vld [vmem:[%s1616_s0 + $0x18] sm:$0xff]   ;;  %v1334_v11 = vld [vmem:[%s1616_s0 + $0x20] sm:$0xff]   ;;  %v1335_v12 = vld [vmem:[%s1616_s0 + $0x28] sm:$0xff]   ;;  %v775_v40 = vunpack.c.l.s4 %v1377_v39  ;;  %v778_v43 = vshrl.u32 %v777_v41, 7  ;;  %vm1379_vm3 = vmmov 0  }
   0x4   :  { %1235 = vmatprep.subr.bf16.mxu0 %v1328_v3  ;;  %v1336_v13 = vld [vmem:[%s1616_s0 + $0x30] sm:$0xff]   ;;  %v1337_v14 = vld [vmem:[%s1616_s0 + $0x38] sm:$0xff]   ;;  %v1338_v15 = vld [vmem:[%s1616_s0 + $0x40] sm:$0xff]   ;;  %vm977_vm4 = vcmask 130048   ;;  %vm898_vm5 = vcmask 261120   ;;  %vm943_vm6 = vcmask 123904  }
   0x5   :  { %v1339_v16 = vld [vmem:[%s1616_s0 + $0x48] sm:$0xff]   ;;  %v1340_v17 = vld [vmem:[%s1616_s0 + $0x50] sm:$0xff]   ;;  %v1341_v18 = vld [vmem:[%s1616_s0 + $0x58] sm:$0xff]   ;;  %v776_v42 = vunpack.c.0.s8 %v775_v40  ;;  %vm1044_vm7 = vcmask 517120   ;;  %vm1061_vm8 = vcmask 1024  }
   0x6   :  { %v1342_v19 = vld [vmem:[%s1616_s0 + $0x60] sm:$0xff]   ;;  %v1343_v20 = vld [vmem:[%s1616_s0 + $0x68] sm:$0xff]   ;;  %v1344_v21 = vld [vmem:[%s1616_s0 + $0x70] sm:$0xff]  }
   0x7   :  { %1236 = vmatpush3.bf16.msra.mxu0 %v1328_v3  ;;  %v1345_v22 = vld [vmem:[%s1616_s0 + $0x78] sm:$0xff]   ;;  %v1346_v23 = vld [vmem:[%s1616_s0 + $0x80] sm:$0xff]   ;;  %v1347_v24 = vld [vmem:[%s1616_s0 + $0x88] sm:$0xff]   ;;  %v779_v46 = vsub.s32 %v776_v42, %v778_v43 }
   0x8   :  { %1237 = vmatprep.subr.bf16.mxu0 %v377_v7  ;;  %v1348_v25 = vld [vmem:[%s1616_s0 + $0x90] sm:$0xff]   ;;  %v1349_v26 = vld [vmem:[%s1616_s0 + $0x98] sm:$0xff]   ;;  %v1350_v27 = vld [vmem:[%s1616_s0 + $0xa0] sm:$0xff]  }
   0x9   :  { %v1351_v28 = vld [vmem:[%s1616_s0 + $0xa8] sm:$0xff]   ;;  %v1352_v29 = vld [vmem:[%s1616_s0 + $0xb0] sm:$0xff]   ;;  %v1353_v30 = vld [vmem:[%s1616_s0 + $0xb8] sm:$0xff]  }
   0xa   :  { %v1354_v31 = vld [vmem:[%s1616_s0 + $0xc0] sm:$0xff]   ;;  %v1355_v32 = vld [vmem:[%s1616_s0 + $0xc8] sm:$0xff]   ;;  %v1356_v33 = vld [vmem:[%s1616_s0 + $0xd0] sm:$0xff]  }
   0xb   :  { %1238 = vmatpush3.bf16.msra.mxu0 %v377_v7  ;;  %v1357_v34 = vld [vmem:[%s1616_s0 + $0xd8] sm:$0xff]   ;;  %v1358_v35 = vld [vmem:[%s1616_s0 + $0xe0] sm:$0xff]   ;;  %v1359_v36 = vld [vmem:[%s1616_s0 + $0xe8] sm:$0xff]  }
   0xc   :  { %v1360_v37 = vld [vmem:[%s1616_s0 + $0xf0] sm:$0xff]   ;;  %v1361_v38 = vld [vmem:[%s1616_s0 + $0xf8] sm:$0xff]   ;;  %v1134_v44 = vld.sshfl [vmem:[%s1617_s2] sm:$0x33 pattern:$0x75316420] }
   0xd   :  { %v773_v45 = vcombine.high %v1134_v44, %v1134_v44  ;;  %v1567_v48 = vrot.slane %v1134_v44, %v779_v46 }
   0xe   :  { %1240 = vmatmul.mubr.msk.bf16.vlgmr.msra.gmra.mrb[0].mxu0 %vm275_vm2, %v1331_v8 }
   0xf   :  { %1243 = vmatprep.mubr.msk.bf16.mxu0 %vm275_vm2, %v1332_v9  ;;  %v1565_v47 = vrot.slane %v773_v45, %v779_v46 }
  0x11   :  { %826 = vmatprep.mubr.bf16.mxu1 %v1565_v47 }
  0x16   :  { %1244 = vmatmul.mubr.msk.bf16.gmra.mrb[4].mxu0 %vm275_vm2, %v1333_v10 }
  0x17   :  { %1247 = vmatprep.mubr.msk.bf16.mxu0 %vm275_vm2, %v1334_v11 }
  0x1e   :  { %1248 = vmatmul.mubr.msk.bf16.gmra.mrb[8].mxu0 %vm275_vm2, %v1335_v12 }
  0x1f   :  { %1251 = vmatprep.mubr.msk.bf16.mxu0 %vm275_vm2, %v1336_v13 }
  0x26   :  { %1252 = vmatmul.mubr.msk.bf16.gmra.mrb[12].mxu0 %vm275_vm2, %v1337_v14 }
  0x27   :  { %1255 = vmatprep.mubr.msk.bf16.mxu0 %vm275_vm2, %v1338_v15 }
  0x2e   :  { %1256 = vmatmul.mubr.msk.bf16.gmra.mrb[16].mxu0 %vm275_vm2, %v1339_v16 }
  0x2f   :  { %1259 = vmatprep.mubr.msk.bf16.mxu0 %vm275_vm2, %v1340_v17 }
  0x36   :  { %1260 = vmatmul.mubr.msk.bf16.gmra.mrb[20].mxu0 %vm275_vm2, %v1341_v18 }
  0x37   :  { %1263 = vmatprep.mubr.msk.bf16.mxu0 %vm275_vm2, %v1342_v19 }
  0x3e   :  { %1264 = vmatmul.mubr.msk.bf16.gmra.mrb[24].mxu0 %vm275_vm2, %v1343_v20 }
  0x3f   :  { %1267 = vmatprep.mubr.msk.bf16.mxu0 %vm275_vm2, %v1344_v21 }
  0x46   :  { %1268 = vmatmul.mubr.msk.bf16.gmra.mrb[28].mxu0 %vm275_vm2, %v1345_v22 }
  0x47   :  { %1271 = vmatprep.mubr.msk.bf16.mxu0 %vm275_vm2, %v1346_v23 }
  0x4e   :  { %1272 = vmatmul.mubr.msk.bf16.gmra.mrb[32].mxu0 %vm275_vm2, %v1347_v24 }
  0x4f   :  { %1275 = vmatprep.mubr.msk.bf16.mxu0 %vm275_vm2, %v1348_v25 }
  0x56   :  { %1276 = vmatmul.mubr.msk.bf16.gmra.mrb[36].mxu0 %vm275_vm2, %v1349_v26 }
  0x57   :  { %1279 = vmatprep.mubr.msk.bf16.mxu0 %vm275_vm2, %v1350_v27 }
  0x5e   :  { %1280 = vmatmul.mubr.msk.bf16.gmra.mrb[40].mxu0 %vm275_vm2, %v1351_v28 }
  0x5f   :  { %1283 = vmatprep.mubr.msk.bf16.mxu0 %vm275_vm2, %v1352_v29 }
  0x66   :  { %1284 = vmatmul.mubr.msk.bf16.gmra.mrb[44].mxu0 %vm275_vm2, %v1353_v30 }
  0x67   :  { %1287 = vmatprep.mubr.msk.bf16.mxu0 %vm275_vm2, %v1354_v31 }
  0x6e   :  { %1288 = vmatmul.mubr.msk.bf16.gmra.mrb[48].mxu0 %vm275_vm2, %v1355_v32 }
  0x6f   :  { %1291 = vmatprep.mubr.msk.bf16.mxu0 %vm275_vm2, %v1356_v33 }
  0x76   :  { %1292 = vmatmul.mubr.msk.bf16.gmra.mrb[52].mxu0 %vm275_vm2, %v1357_v34 }
  0x77   :  { %1295 = vmatprep.mubr.msk.bf16.mxu0 %vm275_vm2, %v1358_v35 }
  0x7e   :  { %1296 = vmatmul.mubr.msk.bf16.gmra.mrb[56].mxu0 %vm275_vm2, %v1359_v36 }
  0x7f   :  { %1299 = vmatprep.mubr.msk.bf16.mxu0 %vm275_vm2, %v1360_v37 }
  0x86   :  { %1300 = vmatmul.mubr.msk.bf16.gmra.mrb[60].mxu0 %vm275_vm2, %v1361_v38 }
  0xe1   :  { %v1241_v49 = vpop.f32.mrb[0].mxu0 }
  0xe2   :  { %v413_v50 = vpop.f32.mrb[1].mxu0  ;;  %v670_v52 = vmax.f32 %v1241_v49, 0.0 }
  0xe3   :  { %v1242_v51 = vpop.f32.mrb[2].mxu0  ;;  %v668_v55 = vmax.f32 %v413_v50, 0.0 }
  0xe4   :  { %v671_v53 = vmax.f32 %v1242_v51, 0.0  ;;  %v416_v54 = vpop.f32.mrb[3].mxu0 }
  0xe5   :  { %v669_v56 = vmax.f32 %v416_v54, 0.0 }
  0xe6   :  { %v734_v57 = vpack.c.bf16 %v671_v53, %v670_v52 }
  0xe7   :  { %v733_v58 = vpack.c.bf16 %v669_v56, %v668_v55 }
  0xe9   :  { %v1245_v59 = vpop.f32.mrb[4].mxu0 }
  0xea   :  { %v429_v60 = vpop.f32.mrb[5].mxu0  ;;  %v674_v62 = vmax.f32 %v1245_v59, 0.0 }
  0xeb   :  { %v1246_v61 = vpop.f32.mrb[6].mxu0  ;;  %v672_v1 = vmax.f32 %v429_v60, 0.0 }
  0xec   :  { %v675_v63 = vmax.f32 %v1246_v61, 0.0  ;;  %v432_v0 = vpop.f32.mrb[7].mxu0 }
  0xed   :  { %v673_v2 = vmax.f32 %v432_v0, 0.0 }
  0xee   :  { %v736_v3 = vpack.c.bf16 %v675_v63, %v674_v62 }
  0xef   :  { %v735_v4 = vpack.c.bf16 %v673_v2, %v672_v1 }
  0xf1   :  { %v1249_v5 = vpop.f32.mrb[8].mxu0 }
  0xf2   :  { %v445_v6 = vpop.f32.mrb[9].mxu0  ;;  %v678_v8 = vmax.f32 %v1249_v5, 0.0 }
  0xf3   :  { %v1250_v7 = vpop.f32.mrb[10].mxu0  ;;  %v676_v11 = vmax.f32 %v445_v6, 0.0 }
  0xf4   :  { %v679_v9 = vmax.f32 %v1250_v7, 0.0  ;;  %v448_v10 = vpop.f32.mrb[11].mxu0 }
  0xf5   :  { %v677_v12 = vmax.f32 %v448_v10, 0.0 }
  0xf6   :  { %v738_v13 = vpack.c.bf16 %v679_v9, %v678_v8 }
  0xf7   :  { %v737_v14 = vpack.c.bf16 %v677_v12, %v676_v11  ;;  %v789_v12 = vcombine.high %v1565_v47, %v1565_v47 }
  0xf9   :  { %v1253_v15 = vpop.f32.mrb[12].mxu0 }
  0xfa   :  { %v461_v16 = vpop.f32.mrb[13].mxu0  ;;  %v682_v18 = vmax.f32 %v1253_v15, 0.0 }
  0xfb   :  { %v1254_v17 = vpop.f32.mrb[14].mxu0  ;;  %v680_v21 = vmax.f32 %v461_v16, 0.0 }
  0xfc   :  { %v683_v19 = vmax.f32 %v1254_v17, 0.0  ;;  %v464_v20 = vpop.f32.mrb[15].mxu0 }
  0xfd   :  { %v681_v22 = vmax.f32 %v464_v20, 0.0 }
  0xfe   :  { %v1570_v23 = vpack.c.bf16 %v683_v19, %v682_v18 }
  0xff   :  { %v739_v24 = vpack.c.bf16 %v681_v22, %v680_v21 }
 0x101   :  { %v1257_v25 = vpop.f32.mrb[16].mxu0 }
 0x102   :  { %v477_v26 = vpop.f32.mrb[17].mxu0  ;;  %v686_v28 = vmax.f32 %v1257_v25, 0.0 }
 0x103   :  { %v1258_v27 = vpop.f32.mrb[18].mxu0  ;;  %v684_v31 = vmax.f32 %v477_v26, 0.0 }
 0x104   :  { %v687_v29 = vmax.f32 %v1258_v27, 0.0  ;;  %v480_v30 = vpop.f32.mrb[19].mxu0 }
 0x105   :  { %v685_v32 = vmax.f32 %v480_v30, 0.0 }
 0x106   :  { %v742_v33 = vpack.c.bf16 %v687_v29, %v686_v28 }
 0x107   :  { %v741_v34 = vpack.c.bf16 %v685_v32, %v684_v31 }
 0x109   :  { %v1261_v35 = vpop.f32.mrb[20].mxu0  ;;  %1181 = vmatprep.subr.bf16.mxu1 %v741_v34 }
 0x10a   :  { %v493_v36 = vpop.f32.mrb[21].mxu0  ;;  %1182 = vmatpush3.bf16.msra.mxu1 %v733_v58  ;;  %v690_v38 = vmax.f32 %v1261_v35, 0.0 }
 0x10b   :  { %v1262_v37 = vpop.f32.mrb[22].mxu0  ;;  %1183 = vmatprep.subr.bf16.mxu1 %v742_v33  ;;  %v688_v41 = vmax.f32 %v493_v36, 0.0 }
 0x10c   :  { %v691_v39 = vmax.f32 %v1262_v37, 0.0  ;;  %v496_v40 = vpop.f32.mrb[23].mxu0 }
 0x10d   :  { %v689_v42 = vmax.f32 %v496_v40, 0.0 }
 0x10e   :  { %v744_v43 = vpack.c.bf16 %v691_v39, %v690_v38  ;;  %1184 = vmatpush3.bf16.msra.mxu1 %v734_v57 }
 0x10f   :  { %v743_v44 = vpack.c.bf16 %v689_v42, %v688_v41 }
 0x111   :  { %v1265_v45 = vpop.f32.mrb[24].mxu0  ;;  %1185 = vmatprep.subr.bf16.mxu1 %v743_v44 }
 0x112   :  { %v509_v46 = vpop.f32.mrb[25].mxu0  ;;  %1186 = vmatpush3.bf16.msra.mxu1 %v735_v4  ;;  %v694_v50 = vmax.f32 %v1265_v45, 0.0 }
 0x113   :  { %v1266_v49 = vpop.f32.mrb[26].mxu0  ;;  %1187 = vmatprep.subr.bf16.mxu1 %v744_v43  ;;  %v692_v53 = vmax.f32 %v509_v46, 0.0 }
 0x114   :  { %v695_v51 = vmax.f32 %v1266_v49, 0.0  ;;  %v512_v52 = vpop.f32.mrb[27].mxu0 }
 0x115   :  { %v693_v54 = vmax.f32 %v512_v52, 0.0 }
 0x116   :  { %v746_v55 = vpack.c.bf16 %v695_v51, %v694_v50  ;;  %1188 = vmatpush3.bf16.msra.mxu1 %v736_v3 }
 0x117   :  { %v745_v56 = vpack.c.bf16 %v693_v54, %v692_v53 }
 0x119   :  { %v1269_v58 = vpop.f32.mrb[28].mxu0  ;;  %1189 = vmatprep.subr.bf16.mxu1 %v745_v56 }
 0x11a   :  { %v525_v59 = vpop.f32.mrb[29].mxu0  ;;  %1190 = vmatpush3.bf16.msra.mxu1 %v737_v14  ;;  %v698_v60 = vmax.f32 %v1269_v58, 0.0 }
 0x11b   :  { %v1270_v57 = vpop.f32.mrb[30].mxu0  ;;  %1191 = vmatprep.subr.bf16.mxu1 %v746_v55  ;;  %v696_v63 = vmax.f32 %v525_v59, 0.0 }
 0x11c   :  { %v699_v61 = vmax.f32 %v1270_v57, 0.0  ;;  %v528_v62 = vpop.f32.mrb[31].mxu0 }
 0x11d   :  { %v697_v0 = vmax.f32 %v528_v62, 0.0 }
 0x11e   :  { %v748_v1 = vpack.c.bf16 %v699_v61, %v698_v60  ;;  %1192 = vmatpush3.bf16.msra.mxu1 %v738_v13 }
 0x11f   :  { %v747_v2 = vpack.c.bf16 %v697_v0, %v696_v63 }
 0x121   :  { %v1273_v4 = vpop.f32.mrb[32].mxu0  ;;  %1193 = vmatprep.subr.bf16.mxu1 %v747_v2 }
 0x122   :  { %v541_v5 = vpop.f32.mrb[33].mxu0  ;;  %1194 = vmatpush3.bf16.msra.mxu1 %v739_v24  ;;  %v702_v6 = vmax.f32 %v1273_v4, 0.0 }
 0x123   :  { %v1274_v3 = vpop.f32.mrb[34].mxu0  ;;  %1195 = vmatprep.subr.bf16.mxu1 %v748_v1  ;;  %v700_v9 = vmax.f32 %v541_v5, 0.0 }
 0x124   :  { %v703_v7 = vmax.f32 %v1274_v3, 0.0  ;;  %v544_v8 = vpop.f32.mrb[35].mxu0 }
 0x125   :  { %v701_v10 = vmax.f32 %v544_v8, 0.0 }
 0x126   :  { %v750_v11 = vpack.c.bf16 %v703_v7, %v702_v6  ;;  %1196 = vmatpush3.bf16.msra.mxu1 %v1570_v23 }
 0x127   :  { %v749_v14 = vpack.c.bf16 %v701_v10, %v700_v9 }
 0x129   :  { %v1277_v13 = vpop.f32.mrb[36].mxu0  ;;  %827 = vmatmul.mubr.bf16.vlgmr.msra.gmra.mrb[0].mxu1 %v1567_v48 }
 0x12a   :  { %v557_v15 = vpop.f32.mrb[37].mxu0  ;;  %866 = vmatprep.mubr.bf16.mxu1 %v789_v12  ;;  %v706_v17 = vmax.f32 %v1277_v13, 0.0 }
 0x12b   :  { %v1278_v16 = vpop.f32.mrb[38].mxu0  ;;  %v704_v20 = vmax.f32 %v557_v15, 0.0 }
 0x12c   :  { %v707_v18 = vmax.f32 %v1278_v16, 0.0  ;;  %v560_v19 = vpop.f32.mrb[39].mxu0 }
 0x12d   :  { %v705_v21 = vmax.f32 %v560_v19, 0.0 }
 0x12e   :  { %v752_v22 = vpack.c.bf16 %v707_v18, %v706_v17 }
 0x12f   :  { %v751_v24 = vpack.c.bf16 %v705_v21, %v704_v20  ;;  %v788_v21 = vcombine.high %v1567_v48, %v1567_v48 }
 0x131   :  { %v1281_v25 = vpop.f32.mrb[40].mxu0 }
 0x132   :  { %v573_v26 = vpop.f32.mrb[41].mxu0  ;;  %v710_v27 = vmax.f32 %v1281_v25, 0.0  ;;  %v1363_v25 = vld [vmem:[%s1618_s3 + $0x8] sm:$0xff]  }
 0x133   :  { %v1282_v23 = vpop.f32.mrb[42].mxu0  ;;  %v708_v29 = vmax.f32 %v573_v26, 0.0 }
 0x134   :  { %v711_v28 = vmax.f32 %v1282_v23, 0.0  ;;  %v576_v47 = vpop.f32.mrb[43].mxu0 }
 0x135   :  { %v709_v30 = vmax.f32 %v576_v47, 0.0 }
 0x136   :  { %v754_v31 = vpack.c.bf16 %v711_v28, %v710_v27 }
 0x137   :  { %v753_v32 = vpack.c.bf16 %v709_v30, %v708_v29 }
 0x139   :  { %v1285_v33 = vpop.f32.mrb[44].mxu0 }
 0x13a   :  { %v589_v34 = vpop.f32.mrb[45].mxu0  ;;  %v714_v36 = vmax.f32 %v1285_v33, 0.0 }
 0x13b   :  { %v1286_v35 = vpop.f32.mrb[46].mxu0  ;;  %v712_v39 = vmax.f32 %v589_v34, 0.0 }
 0x13c   :  { %v715_v37 = vmax.f32 %v1286_v35, 0.0  ;;  %v592_v38 = vpop.f32.mrb[47].mxu0 }
 0x13d   :  { %v713_v40 = vmax.f32 %v592_v38, 0.0 }
 0x13e   :  { %v756_v41 = vpack.c.bf16 %v715_v37, %v714_v36  ;;  %v1365_v37 = vld [vmem:[%s1619_s5 + $0x8] sm:$0xff]  }
 0x13f   :  { %v755_v42 = vpack.c.bf16 %v713_v40, %v712_v39  ;;  %v985_v38 = vsel %vm977_vm4, %v1365_v37, 0  ;;  %v1366_v39 = vld [vmem:[%s1619_s5 + $0x10] sm:$0xff]  }
 0x140   :  { %v988_v40 = vsel %vm977_vm4, %v1366_v39, 0 }
 0x141   :  { %v1289_v43 = vpop.f32.mrb[48].mxu0 }
 0x142   :  { %v605_v44 = vpop.f32.mrb[49].mxu0  ;;  %v718_v46 = vmax.f32 %v1289_v43, 0.0  ;;  %v1135_v43 = vld [vmem:[%s1620_s4] ss:$0 sm:$0xff] }
 0x143   :  { %v1290_v45 = vpop.f32.mrb[50].mxu0  ;;  %v716_v51 = vmax.f32 %v605_v44, 0.0 }
 0x144   :  { %v719_v49 = vmax.f32 %v1290_v45, 0.0  ;;  %v608_v50 = vpop.f32.mrb[51].mxu0 }
 0x145   :  { %v717_v52 = vmax.f32 %v608_v50, 0.0 }
 0x146   :  { %v758_v53 = vpack.c.bf16 %v719_v49, %v718_v46 }
 0x147   :  { %v757_v54 = vpack.c.bf16 %v717_v52, %v716_v51 }
 0x149   :  { %v1293_v55 = vpop.f32.mrb[52].mxu0  ;;  %1203 = vmatprep.subr.bf16.mxu1 %v757_v54 }
 0x14a   :  { %v621_v56 = vpop.f32.mrb[53].mxu0  ;;  %1204 = vmatpush3.bf16.msra.mxu1 %v749_v14  ;;  %v722_v59 = vmax.f32 %v1293_v55, 0.0 }
 0x14b   :  { %v1294_v58 = vpop.f32.mrb[54].mxu0  ;;  %1205 = vmatprep.subr.bf16.mxu1 %v758_v53  ;;  %v720_v61 = vmax.f32 %v621_v56, 0.0 }
 0x14c   :  { %v723_v57 = vmax.f32 %v1294_v58, 0.0  ;;  %v624_v60 = vpop.f32.mrb[55].mxu0  ;;  %v1144_v58 = vld [vmem:[%s1621_s6] ss:$0 sm:$0xff] }
 0x14d   :  { %v721_v62 = vmax.f32 %v624_v60, 0.0 }
 0x14e   :  { %v760_v63 = vpack.c.bf16 %v723_v57, %v722_v59  ;;  %1206 = vmatpush3.bf16.msra.mxu1 %v750_v11 }
 0x14f   :  { %v759_v0 = vpack.c.bf16 %v721_v62, %v720_v61 }
 0x151   :  { %v1297_v1 = vpop.f32.mrb[56].mxu0  ;;  %1207 = vmatprep.subr.bf16.mxu1 %v759_v0 }
 0x152   :  { %v637_v2 = vpop.f32.mrb[57].mxu0  ;;  %1208 = vmatpush3.bf16.msra.mxu1 %v751_v24  ;;  %v726_v5 = vmax.f32 %v1297_v1, 0.0  ;;  %v1362_v24 = vld [vmem:[%s1618_s3] sm:$0xff]  }
 0x153   :  { %v1298_v4 = vpop.f32.mrb[58].mxu0  ;;  %1209 = vmatprep.subr.bf16.mxu1 %v760_v63  ;;  %v724_v7 = vmax.f32 %v637_v2, 0.0 }
 0x154   :  { %v727_v3 = vmax.f32 %v1298_v4, 0.0  ;;  %v640_v6 = vpop.f32.mrb[59].mxu0  ;;  %v1049_v4 = vstv %s1622_s7 }
 0x155   :  { %v725_v8 = vmax.f32 %v640_v6, 0.0 }
 0x156   :  { %v762_v9 = vpack.c.bf16 %v727_v3, %v726_v5  ;;  %1210 = vmatpush3.bf16.msra.mxu1 %v752_v22  ;;  %v1378_v22 = vmov 0.0  }
 0x157   :  { %v761_v10 = vpack.c.bf16 %v725_v8, %v724_v7 }
 0x159   :  { %v1301_v12 = vpop.f32.mrb[60].mxu0  ;;  %1211 = vmatprep.subr.bf16.mxu1 %v761_v10 }
 0x15a   :  { %v653_v14 = vpop.f32.mrb[61].mxu0  ;;  %1212 = vmatpush3.bf16.msra.mxu1 %v753_v32  ;;  %v730_v13 = vmax.f32 %v1301_v12, 0.0  ;;  %v1364_v32 = vld [vmem:[%s1619_s5] sm:$0xff]  }
 0x15b   :  { %v1302_v11 = vpop.f32.mrb[62].mxu0  ;;  %1213 = vmatprep.subr.bf16.mxu1 %v762_v9  ;;  %v728_v17 = vmax.f32 %v653_v14, 0.0  ;;  %v982_v36 = vsel %vm977_vm4, %v1364_v32, 0 }
 0x15c   :  { %v731_v15 = vmax.f32 %v1302_v11, 0.0  ;;  %v656_v16 = vpop.f32.mrb[63].mxu0 }
 0x15d   :  { %v729_v18 = vmax.f32 %v656_v16, 0.0 }
 0x15e   :  { %v764_v19 = vpack.c.bf16 %v731_v15, %v730_v13  ;;  %1214 = vmatpush3.bf16.msra.mxu1 %v754_v31 }
 0x15f   :  { %v763_v20 = vpack.c.bf16 %v729_v18, %v728_v17 }
 0x161   :  { %1215 = vmatprep.subr.bf16.mxu1 %v763_v20 }
 0x162   :  { %1216 = vmatpush3.bf16.msra.mxu1 %v755_v42 }
 0x163   :  { %1217 = vmatprep.subr.bf16.mxu1 %v764_v19 }
 0x166   :  { %1218 = vmatpush3.bf16.msra.mxu1 %v756_v41  ;;  %v1367_v41 = vld [vmem:[%s1619_s5 + $0x18] sm:$0xff]  }
 0x167   :  { %1303 = vmatprep.subr.bf16.mxu1 %v1378_v22  ;;  %v991_v42 = vsel %vm977_vm4, %v1367_v41, 0 }
 0x169   :  { %867 = vmatmul.mubr.bf16.vlgmr.msra.gmra.mrb[4].mxu1 %v788_v21 }
 0x16a   :  { %1304 = vmatpush3.bf16.msra.mxu1 %v1362_v24  ;;  %1307 = vmatprep.mubr.msk.bf16.mxu1 %vm1379_vm3, %v1378_v22 }
 0x16b   :  { %1305 = vmatprep.subr.bf16.mxu1 %v1378_v22 }
 0x16e   :  { %1306 = vmatpush3.bf16.msra.mxu1 %v1363_v25 }
 0x16f   :  { %1311 = vmatprep.subr.bf16.mxu1 %v1378_v22 }
 0x1fc   :  { %v1197_v48 = vpop.f32.mrb[0].mxu1 }
 0x1fd   :  { %v1198_v26 = vpop.f32.mrb[1].mxu1 }
 0x1fe   :  { %v1199_v23 = vadd.f32 %v1198_v26, %v1197_v48  ;;  %v1200_v27 = vpop.f32.mrb[2].mxu1 }
 0x1ff   :  { %v1201_v28 = vpop.f32.mrb[3].mxu1 }
 0x23c   :  { %v1219_v47 = vpop.f32.mrb[4].mxu1 }
 0x23d   :  { %v1220_v29 = vpop.f32.mrb[5].mxu1 }
 0x23e   :  { %v1221_v30 = vadd.f32 %v1220_v29, %v1219_v47  ;;  %v1222_v31 = vpop.f32.mrb[6].mxu1 }
 0x23f   :  { %v1223_v33 = vpop.f32.mrb[7].mxu1 }
 0x240   :  { %v869_v34 = vadd.f32 %v1221_v30, %v1199_v23 }
 0x242   :  { %v874_v35 = vpack.c.bf16 %v869_v34, %v869_v34 }
 0x244   :  { %1308 = vmatmul.mubr.msk.bf16.vlgmr.msra.gmra.mrb[8].mxu1 %vm898_vm5, %v874_v35 }
 0x245   :  { %1312 = vmatpush3.bf16.xpose.msra.mxu1 %v982_v36  ;;  %1319 = vmatprep.mubr.msk.bf16.mxu1 %vm1379_vm3, %v1378_v22 }
 0x246   :  { %1313 = vmatprep.subr.bf16.mxu1 %v1378_v22 }
 0x24d   :  { %1314 = vmatpush3.bf16.xpose.msra.mxu1 %v985_v38 }
 0x24e   :  { %1315 = vmatprep.subr.bf16.mxu1 %v1378_v22 }
 0x255   :  { %1316 = vmatpush3.bf16.xpose.msra.mxu1 %v988_v40 }
 0x256   :  { %1317 = vmatprep.subr.bf16.mxu1 %v1378_v22 }
 0x25d   :  { %1318 = vmatpush3.bf16.xpose.msra.mxu1 %v991_v42 }
 0x317   :  { %v936_v44 = vpop.f32.mrb[8].mxu1 }
 0x318   :  { %v937_v45 = vadd.f32 %v1135_v43, %v936_v44  ;;  %v1309_v46 = vpop.f32.mrb[9].mxu1 }
 0x319   :  { %v939_v49 = vpop.f32.mrb[10].mxu1 }
 0x31a   :  { %v948_v50 = vpack.c.bf16 %v937_v45, %v937_v45  ;;  %v1310_v51 = vpop.f32.mrb[11].mxu1  ;;  %v942_v52 = vmul.f32 %v937_v45, %v937_v45 }
 0x31c   :  { %1320 = vmatmul.mubr.msk.bf16.vlgmr.msra.gmra.mrb[12].mxu1 %vm977_vm4, %v948_v50  ;;  %v944_v53 = vsel %vm943_vm6, %v942_v52, 0.0 }
 0x31d   :  { %945 = vadd.xlane.f32.xlu0 %v944_v53 }
 0x3aa   :  { %v946_v54 = vpop.xlane.xlu0 %945 }
 0x3ab   :  { %v947_v55 = vmul.f32 -0.5, %v946_v54 }
 0x3ef   :  { %v1027_v56 = vpop.f32.mrb[12].mxu1 }
 0x3f0   :  { %v1028_v59 = vadd.f32 %v1027_v56, %v947_v55  ;;  %v1321_v57 = vpop.f32.mrb[13].mxu1 }
 0x3f1   :  { %v1030_v60 = vpop.f32.mrb[14].mxu1 }
 0x3f2   :  { %v1040_v61 = vadd.f32 %v1144_v58, %v1028_v59  ;;  %v1322_v62 = vpop.f32.mrb[15].mxu1 }
 0x3f4   :  { %v1041_v63 = vmin.f32 %v1040_v61, 0.0 }
 0x3f6   :  { %v1042_v0 = vmul.f32 1.442695, %v1041_v63 }
 0x3f8   :  { %1368 = vpow2.f32 %v1042_v0 }
 0x402   :  { %v1369_v1 = vpop.eup %1368 }
 0x403   :  { %v1045_v2 = vsel %vm1044_vm7, %v1369_v1, 0.0 }
 0x404   :  { %1046 = vadd.xlane.f32.xlu0 %v1045_v2 }
 0x491   :  { %v1047_v5 = vpop.xlane.xlu0 %1046 }
 0x492   :  { %v1050_v3 = vmul.f32 %v1049_v4, %v1047_v5 }
 0x494   :  { %v1051_v6 = vadd.f32 1e-30, %v1050_v3 }
 0x496   :  { %1370 = vlog2.f32 %v1051_v6 }
 0x4a0   :  { %v1371_v7 = vpop.eup %1370 }
 0x4a1   :  { %v1053_v8 = vmul.f32 0.6931472, %v1371_v7 }
 0x4a3   :  { %v1145_v9 = vadd.f32 -12.0, %v1053_v8 }
 0x4a5   :  { %v1055_v10 = vmul.f32 0.05, %v1145_v9 }
 0x4a7   :  { %v1056_v12 = vmul.f32 1.442695, %v1055_v10 }
 0x4a9   :  { %1372 = vpow2.f32 %v1056_v12 }
 0x4b3   :  { %v1373_v14 = vpop.eup %1372 }
 0x4b4   :  { %v1058_v11 = vadd.f32 1.0, %v1373_v14 }
 0x4b6   :  { %1374 = vrcp.f32 %v1058_v11 }
 0x4c0   :  { %v1375_v13 = vpop.eup %1374 }
 0x4c1   :  { %1062 = vst.msk [vmem:[%s1623_s8] sm:$0x3] %vm1061_vm8, %v1375_v13 }

</bundles_post_ra>
